<compile_context>
chip_gen: v7x
topology: tpu7x:2x2x1
jax: 0.10.0
libtpu: 0.0.40
codegen_flags: <defaults>
</compile_context>

<pallas_src>
import functools

import jax
import jax.numpy as jnp
from jax import lax
from jax.experimental import pallas as pl
from jax.experimental.pallas import tpu as pltpu

NEG_INF = float("-inf")


def _round_up(x, m):
    return ((x + m - 1) // m) * m


# --------------------------- generation heuristics --------------------------

@functools.lru_cache(maxsize=None)
def _tpu_kind():
    try:
        return jax.devices()[0].device_kind.lower()
    except Exception:  # pragma: no cover
        return ""


def _big_vmem():
    # v5e/v5p/v6e have 128 MiB VMEM per core; v7x (and unknown) treated as 64 MiB.
    k = _tpu_kind()
    return ("v5" in k) or ("v6" in k)


def _vmem_limit():
    return (64 << 20) if _big_vmem() else (32 << 20)


def _bf16_transcendental():
    # v6e/v7x have bf16 VPU/EUP; keep f32 transcendentals elsewhere (v5e/v4).
    k = _tpu_kind()
    return ("v6" in k) or ("v7" in k)


# ----------------------------- Pallas kernels ------------------------------

def _linear_kernel(x_ref, w_ref, b_ref, o_ref):
    # o = x @ w + b ;  x:(TM,K) bf16 (cast in wrapper), w:(K,N) bf16, b:(1,N) f32
    o_ref[...] = (
        jnp.dot(x_ref[...], w_ref[...], preferred_element_type=jnp.float32)
        + b_ref[...]
    )


def pallas_linear(x, w_bf16, b, tile_m=None):
    """Row-tiled linear projection.  Weights stay resident in VMEM; the row
    axis is tiled (TM) and marked parallel so it pipelines / megacore-shards.
    Input is cast to bf16 in the wrapper: this matmul is memory-bound, so the
    dominant streamed operand is halved in HBM bytes and VMEM footprint."""
    if tile_m is None:
        tile_m = 1024 if _big_vmem() else 512
    M, K = x.shape
    N = w_bf16.shape[1]
    x = x.astype(jnp.bfloat16)
    tm = min(tile_m, _round_up(M, 8))
    m_pad = pl.cdiv(M, tm) * tm
    if m_pad != M:
        x = jnp.pad(x, ((0, m_pad - M), (0, 0)))

    # TODO(synk): mark w/b BlockSpecs with pipeline_mode=pl.Buffered(1) once the
    # installed JAX reliably supports single-buffered resident operands.
    out = pl.pallas_call(
        _linear_kernel,
        out_shape=jax.ShapeDtypeStruct((m_pad, N), jnp.float32),
        grid=(m_pad // tm,),
        in_specs=[
            pl.BlockSpec((tm, K), lambda i: (i, 0)),
            pl.BlockSpec((K, N), lambda i: (0, 0)),
            pl.BlockSpec((1, N), lambda i: (0, 0)),
        ],
        out_specs=pl.BlockSpec((tm, N), lambda i: (i, 0)),
        compiler_params=pltpu.CompilerParams(
            dimension_semantics=("parallel",),
            vmem_limit_bytes=_vmem_limit(),
        ),
        cost_estimate=pl.CostEstimate(
            flops=2 * m_pad * K * N,
            transcendentals=0,
            bytes_accessed=m_pad * K * 2 + K * N * 2 + N * 4 + m_pad * N * 4,
        ),
    )(x, w_bf16, b.reshape(1, N))
    return out[:M]


def _dec_conv_kernel(emb_ref, w_ref, o_ref):
    # depthwise causal conv (context_size == 2) followed by ReLU.
    # "prev" is built in-kernel (zero row + shifted view) so no haloed slab is
    # ever materialized in HBM.
    bblk, u, c = o_ref.shape
    x = emb_ref[...]                                        # (Bblk, U, C)
    w = w_ref[...]                                          # (2, C)
    prev = jnp.concatenate(
        [jnp.zeros((bblk, 1, c), x.dtype), x[:, : u - 1, :]], axis=1)
    o_ref[...] = jnp.maximum(prev * w[0] + x * w[1], 0.0)


def pallas_decoder_conv(emb, w, batch_block=8):
    """Decoder depthwise conv + ReLU.  Several batches per grid step: per-step
    work is tiny, so batching amortizes the ~0.35 us/step pipeline overhead and
    presents larger DMA descriptors."""
    B, U, C = emb.shape
    bblk = min(batch_block, B)
    b_pad = pl.cdiv(B, bblk) * bblk
    if b_pad != B:
        emb = jnp.pad(emb, ((0, b_pad - B), (0, 0), (0, 0)))
    out = pl.pallas_call(
        _dec_conv_kernel,
        out_shape=jax.ShapeDtypeStruct((b_pad, U, C), jnp.float32),
        grid=(b_pad // bblk,),
        in_specs=[
            pl.BlockSpec((bblk, U, C), lambda i: (i, 0, 0)),
            pl.BlockSpec((2, C), lambda i: (0, 0)),
        ],
        out_specs=pl.BlockSpec((bblk, U, C), lambda i: (i, 0, 0)),
        compiler_params=pltpu.CompilerParams(dimension_semantics=("parallel",)),
    )(emb, w)
    return out[:B]


def _smooth_normalizer_kernel(lm_ref, amt_ref, out_ref):
    # normalizers[s, t] = log(sum_c exp(lm[s, c] + am[t, c]))  (k2-style)
    # am arrives pre-transposed as (C, TT) so this is a plain MXU matmul with
    # no in-kernel transpose, and the (S1, TT) store is lane-dense.
    lm = lm_ref[...]                                 # (S1, C)
    amt = amt_ref[...]                               # (C, TT)
    lm_max = jnp.max(lm, axis=-1, keepdims=True)     # (S1, 1)
    am_max = jnp.max(amt, axis=0, keepdims=True)     # (1, TT)
    prod = jnp.dot(
        jnp.exp(lm - lm_max), jnp.exp(amt - am_max),
        preferred_element_type=jnp.float32,
    )                                                # (S1, TT)
    tiny = jnp.finfo(jnp.float32).tiny
    out_ref[...] = jnp.log(prod + tiny) + lm_max + am_max


def pallas_smooth_normalizers(lm, am, tile_t=512):
    """Per-batch smoothed-loss normalizers, tiled over T (padded to a multiple
    of 128 so output stores are unmasked lane-dense)."""
    B, S1, C = lm.shape
    T = am.shape[1]
    tt = min(tile_t, _round_up(T, 128))
    t_pad = _round_up(T, tt)

    am_t = jnp.transpose(am, (0, 2, 1))              # (B, C, T)
    if t_pad != T:
        am_t = jnp.pad(am_t, ((0, 0), (0, 0), (0, t_pad - T)))

    out = pl.pallas_call(
        _smooth_normalizer_kernel,
        out_shape=jax.ShapeDtypeStruct((B, S1, t_pad), jnp.float32),
        grid=(B, t_pad // tt),
        in_specs=[
            pl.BlockSpec((None, S1, C), lambda b, t: (b, 0, 0)),
            pl.BlockSpec((None, C, tt), lambda b, t: (b, 0, t)),
        ],
        out_specs=pl.BlockSpec((None, S1, tt), lambda b, t: (b, 0, t)),
        # each (b, t-tile) is independent -> both axes parallel (v7x megacore)
        compiler_params=pltpu.CompilerParams(
            dimension_semantics=("parallel", "parallel"),
            vmem_limit_bytes=_vmem_limit(),
        ),
    )(lm, am_t)
    return out[:, :, :T]


def _pruned_joiner_kernel(am_ref, lm_ref, sym_ref, w_ref, b_ref,
                          symlog_ref, blanklog_ref, lse_ref, *,
                          blank_id, tanh_dtype):
    # am_ref : (TT, C) bf16         lm_ref : (R, TT, C) bf16
    # sym_ref: (R, TT, 1) int32     w_ref  : (C, V) bf16   b_ref: (1, V) f32
    # outputs: (R, TT, 1) f32  (symbol logit, blank logit, logsumexp)
    r_ctx, tt, c = lm_ref.shape
    v = w_ref.shape[1]

    # R loop collapsed into a single (R*TT, C) @ (C, V) matmul: amortizes MXU
    # weight pushes / fill-drain vs R small matmuls.
    z = lm_ref[...] + am_ref[...][None, :, :]                       # bf16 (R,TT,C)
    h = jnp.tanh(z.astype(tanh_dtype)).astype(jnp.bfloat16)         # bf16 EUP on v6e/v7x
    logits = (
        jnp.dot(h.reshape(r_ctx * tt, c), w_ref[...],
                preferred_element_type=jnp.float32)
        + b_ref[...]
    )                                                               # (R*TT, V) f32

    # log-sum-exp over vocab (f32 accumulation for stability on all parts)
    m = jnp.max(logits, axis=-1, keepdims=True)
    lse = m + jnp.log(jnp.sum(jnp.exp(logits - m), axis=-1, keepdims=True))

    # gathered-symbol logit via lane select; blank logit via static lane slice
    lane = lax.broadcasted_iota(jnp.int32, (r_ctx * tt, v), 1)
    sym = sym_ref[...].reshape(r_ctx * tt, 1)
    sym_logit = jnp.sum(jnp.where(lane == sym, logits, 0.0),
                        axis=-1, keepdims=True)
    blank_logit = logits[:, blank_id:blank_id + 1]

    symlog_ref[...] = sym_logit.reshape(r_ctx, tt, 1)
    blanklog_ref[...] = blank_logit.reshape(r_ctx, tt, 1)
    lse_ref[...] = lse.reshape(r_ctx, tt, 1)


def pallas_pruned_joiner(am, lm, ranges, symbols_ext, w_bf16, bias, blank_id,
                         tile_t=None):
    """Pruned joiner: logits = tanh(am[b,t] + lm[b, ranges[b,t,r]]) @ W + b.

    The encoder output `am` is read once per (b, t) tile (no R-times broadcast
    in HBM), both big input streams are bf16, and only three narrow per-(b,t,r)
    scalars are written back instead of the full (B, T, R, V) logits tensor."""
    B, T, C = am.shape
    R = ranges.shape[-1]
    V = w_bf16.shape[1]
    if tile_t is None:
        tile_t = 512 if _big_vmem() else 256     # v7x: 64 MiB VMEM, stay modest

    # gather lm / symbols directly in (B, R, T, ...) order so each r is a
    # contiguous leading-dim slab inside the kernel (no in-kernel relayouts);
    # cast to bf16 BEFORE the gather so the gathered tensor is written half-size.
    ranges_rt = jnp.transpose(ranges, (0, 2, 1))                          # (B,R,T)
    lm_bf = lm.astype(jnp.bfloat16)
    am_bf = am.astype(jnp.bfloat16)
    lm_rtc = jax.vmap(lambda lm_b, r_b: lm_b[r_b])(lm_bf, ranges_rt)      # (B,R,T,C) bf16
    sym_rt = jax.vmap(lambda s_b, r_b: s_b[r_b])(symbols_ext, ranges_rt)  # (B,R,T)

    tt = min(tile_t, _round_up(T, 8))
    t_pad = pl.cdiv(T, tt) * tt
    if t_pad != T:
        am_bf = jnp.pad(am_bf, ((0, 0), (0, t_pad - T), (0, 0)))
        lm_rtc = jnp.pad(lm_rtc, ((0, 0), (0, 0), (0, t_pad - T), (0, 0)))
        sym_rt = jnp.pad(sym_rt, ((0, 0), (0, 0), (0, t_pad - T)))
    sym_in = sym_rt[..., None].astype(jnp.int32)                          # (B,R,t_pad,1)

    narrow_shape = jax.ShapeDtypeStruct((B, R, t_pad, 1), jnp.float32)
    narrow_spec = pl.BlockSpec((None, R, tt, 1), lambda b, t: (b, 0, t, 0))
    # Narrow (last-dim-1) outputs use masked stores; total writeback is tiny so
    # this is secondary to never materializing the (B,T,R,V) logits.

    tanh_dtype = jnp.bfloat16 if _bf16_transcendental() else jnp.float32

    flops = 2 * B * t_pad * R * C * V + 6 * B * t_pad * R * (C + V)
    transcend = B * t_pad * R * (C + V)
    bytes_acc = (B * t_pad * C * 2 + B * t_pad * R * C * 2 + B * t_pad * R * 4
                 + C * V * 2 + V * 4 + 3 * B * t_pad * R * 4)

    kernel = functools.partial(_pruned_joiner_kernel, blank_id=blank_id,
                               tanh_dtype=tanh_dtype)
    sym_logit, blank_logit, lse = pl.pallas_call(
        kernel,
        out_shape=(narrow_shape, narrow_shape, narrow_shape),
        grid=(B, t_pad // tt),
        in_specs=[
            pl.BlockSpec((None, tt, C), lambda b, t: (b, t, 0)),        # am (bf16)
            pl.BlockSpec((None, R, tt, C), lambda b, t: (b, 0, t, 0)),  # lm gathered (bf16)
            narrow_spec,                                                # symbols
            pl.BlockSpec((C, V), lambda b, t: (0, 0)),                  # W (bf16)
            pl.BlockSpec((1, V), lambda b, t: (0, 0)),                  # bias
        ],
        out_specs=(narrow_spec, narrow_spec, narrow_spec),
        compiler_params=pltpu.CompilerParams(
            dimension_semantics=("parallel", "parallel"),
            vmem_limit_bytes=_vmem_limit(),
        ),
        cost_estimate=pl.CostEstimate(flops=flops, transcendentals=transcend,
                                      bytes_accessed=bytes_acc),
    )(am_bf, lm_rtc, sym_in, w_bf16, bias.reshape(1, V))

    def unpack(x):   # (B, R, t_pad, 1) -> (B, T, R)   (padded t rows sliced off)
        return jnp.transpose(x[:, :, :T, 0], (0, 2, 1))

    return unpack(sym_logit), unpack(blank_logit), unpack(lse)


# --------------------------- plain-JAX RNNT glue ----------------------------

def mutual_information_scores(px, py, s_end, t_end):
    """k2 mutual_information_recursion forward (scores only).

    px: (B, S, T+1), py: (B, S+1, T).  Returns scores p[b, s_end, t_end]."""
    B, S, T1 = px.shape
    col0 = jnp.concatenate(
        [jnp.zeros((B, 1), px.dtype), jnp.cumsum(px[:, :, 0], axis=1)], axis=1
    )                                               # (B, S+1) : column t = 0

    py_t = jnp.moveaxis(py, 2, 0)                   # (T, B, S+1)
    px_t = jnp.moveaxis(px[:, :, 1:], 2, 0)         # (T, B, S)

    def outer(col_prev, xs):
        py_col, px_col = xs                         # (B,S+1), (B,S)
        top = col_prev + py_col                     # horizontal (blank) arcs

        def inner(carry, xs2):
            px_s, top_s = xs2
            new = jnp.logaddexp(carry + px_s, top_s)
            return new, new

        carry0 = top[:, 0]
        _, rest = lax.scan(inner, carry0, (px_col.T, top[:, 1:].T))
        col = jnp.concatenate([carry0[:, None], rest.T], axis=1)
        return col, col

    _, cols = lax.scan(outer, col0, (py_t, px_t))
    p = jnp.concatenate([col0[:, :, None], jnp.moveaxis(cols, 0, 2)], axis=2)
    return p[jnp.arange(B), s_end, t_end]


def _fix_for_boundary(px, boundary):
    B, S, T1 = px.shape
    t_idx = jnp.arange(T1)[None, None, :]
    return jnp.where(t_idx == boundary[:, 3][:, None, None], NEG_INF, px)


def get_rnnt_logprobs_smoothed(lm, am, symbols, termination_symbol,
                               lm_only_scale, am_only_scale, boundary):
    B, T, C = am.shape
    S = lm.shape[1] - 1
    tiny = jnp.finfo(jnp.float32).tiny

    # joint normalizers: Pallas kernel (matmul + reduction hot path)
    normalizers = pallas_smooth_normalizers(lm, am)            # (B, S+1, T)

    am_max = jnp.max(am, axis=2, keepdims=True)                # (B,T,1)
    lm_max = jnp.max(lm, axis=2, keepdims=True)                # (B,S+1,1)
    am_probs = jnp.exp(am - am_max)
    lm_probs = jnp.exp(lm - lm_max)

    lmonly_raw = jnp.sum(lm_probs, axis=2, keepdims=True)      # (B,S+1,1)
    unigram_lm = jnp.mean(lm_probs / lmonly_raw, axis=(0, 1)) + tiny   # (C,)
    amonly_normalizers = (
        jnp.log(jnp.einsum("btc,c->bt", am_probs, unigram_lm))[:, :, None]
        + am_max
    )                                                          # (B,T,1)
    unigram_lm_log = jnp.log(unigram_lm)                       # (C,)
    lmonly_normalizers = jnp.log(lmonly_raw) + lm_max          # (B,S+1,1)

    # px: probs of actual symbols
    px_am = jnp.transpose(
        jax.vmap(lambda am_b, sym_b: am_b[:, sym_b])(am, symbols), (0, 2, 1)
    )                                                          # (B,S,T)
    px_lm = jnp.take_along_axis(lm[:, :S, :], symbols[:, :, None], axis=2)
    px_lm_unigram = unigram_lm_log[symbols][:, :, None]        # (B,S,1)

    ninf_col = jnp.full((B, S, 1), NEG_INF, jnp.float32)
    px = jnp.concatenate([px_am + px_lm - normalizers[:, :S, :], ninf_col], axis=2)
    px_amonly = jnp.concatenate(
        [px_am + px_lm_unigram - jnp.swapaxes(amonly_normalizers, 1, 2), ninf_col],
        axis=2,
    )
    px_lmonly = px_lm - lmonly_normalizers[:, :S, :]           # (B,S,1)

    # py: probs of termination symbol
    py_am = am[:, :, termination_symbol][:, None, :]           # (B,1,T)
    py_lm = lm[:, :, termination_symbol][:, :, None]           # (B,S+1,1)
    py = py_am + py_lm - normalizers
    py_amonly = (
        py_am + unigram_lm_log[termination_symbol]
        - jnp.swapaxes(amonly_normalizers, 1, 2)
    )
    py_lmonly = py_lm - lmonly_normalizers

    combined_scale = 1.0 - lm_only_scale - am_only_scale
    # mirror k2's epsilon guard against 0 * (-inf) = nan
    eps = 1.0e-20
    if am_only_scale == 0.0:
        am_only_scale = eps
        combined_scale -= eps
    if lm_only_scale == 0.0:
        lm_only_scale = eps
        combined_scale -= eps

    px_interp = px * combined_scale + px_lmonly * lm_only_scale + px_amonly * am_only_scale
    py_interp = py * combined_scale + py_lmonly * lm_only_scale + py_amonly * am_only_scale

    px_interp = _fix_for_boundary(px_interp, boundary)
    return px_interp, py_interp


def _adjust_pruning_lower_bound(s_begin, s_range):
    B, T = s_begin.shape
    t = jnp.arange(T, dtype=jnp.int32)[None, :]
    s_begin = lax.cummax(s_begin, axis=1)
    s_begin = -(s_begin - (s_range - 1) * t)
    s_begin = lax.cummax(s_begin, axis=1)
    s_begin = jnp.maximum(s_begin, 0)
    s_begin = -(s_begin - (s_range - 1) * t)
    return s_begin


def get_rnnt_prune_ranges(px_grad, py_grad, boundary, s_range):
    B, S, T1 = px_grad.shape
    T = py_grad.shape[-1]
    S1 = S + 1
    if s_range > S:
        s_range = S + 1
    n_blk = S1 - s_range + 1

    blk_sum = py_grad[:, 0:n_blk, :]
    for k in range(1, s_range):
        blk_sum = blk_sum + py_grad[:, k:k + n_blk, :]

    px_pad = jnp.concatenate([jnp.zeros((B, 1, T1), px_grad.dtype), px_grad], axis=1)
    final_grad = blk_sum - px_pad[:, :n_blk, :T]                # (B, n_blk, T)
    s_begin = jnp.argmax(final_grad, axis=1).astype(jnp.int32)  # (B, T)

    mask = jnp.arange(T, dtype=jnp.int32)[None, :] < (boundary[:, 3][:, None] - 1)
    s_begin_padding = jnp.maximum(boundary[:, 2][:, None] - s_range + 1, 0).astype(jnp.int32)
    s_begin = jnp.where(mask, s_begin, s_begin_padding)
    s_begin = _adjust_pruning_lower_bound(s_begin, s_range)

    ranges = s_begin[:, :, None] + jnp.arange(s_range, dtype=jnp.int32)[None, None, :]
    return ranges


def _roll_by_shifts(src, shifts):
    # out[b, t, j] = src[b, t, (j - shifts[b, t]) % S]
    B, T, S = src.shape
    idx = (jnp.arange(S, dtype=jnp.int32)[None, None, :] - shifts[:, :, None]) % S
    return jnp.take_along_axis(src, idx, axis=2)


def assemble_pruned_logprobs(px_part, py_part, ranges, boundary, S):
    """px_part/py_part: per-(b,t,r) log-probs (already normalizer-subtracted)
    coming straight out of the pruned joiner kernel."""
    B, T, R = px_part.shape
    pad = jnp.full((B, T, S + 1 - R), NEG_INF, jnp.float32)

    px = jnp.concatenate([px_part, pad], axis=2)                 # (B,T,S+1)
    px = _roll_by_shifts(px, ranges[:, :, 0])[:, :, :S]
    px = jnp.transpose(px, (0, 2, 1))                            # (B,S,T)
    px = jnp.concatenate([px, jnp.full((B, S, 1), NEG_INF, jnp.float32)], axis=2)

    py = jnp.concatenate([py_part, pad], axis=2)
    py = _roll_by_shifts(py, ranges[:, :, 0])
    py = jnp.transpose(py, (0, 2, 1))                            # (B,S+1,T)

    px = _fix_for_boundary(px, boundary)
    return px, py


# ------------------------------ Transducer ---------------------------------

@functools.partial(jax.jit, static_argnames=("prune_range", "am_scale", "lm_scale"))
def transducer_forward(params, x, x_lens, y_padded, y_lens,
                       prune_range=5, am_scale=0.0, lm_scale=0.0):
    assert x.ndim == 3 and x_lens.ndim == 1
    B, T, F = x.shape
    V = params["enc_w"].shape[1]
    S = y_padded.shape[1]
    blank_id = 0

    # encoder (Pallas row-tiled matmul, bf16 operands / f32 accumulate)
    encoder_out = pallas_linear(
        x.reshape(B * T, F), params["enc_w"].astype(jnp.bfloat16), params["enc_b"]
    ).reshape(B, T, V)

    # decoder: add_sos + pad(blank), embedding gather (glue), then
    # depthwise conv (context 2) + ReLU in Pallas (prev built in-kernel)
    sos_y_padded = jnp.concatenate(
        [jnp.full((B, 1), blank_id, y_padded.dtype), y_padded], axis=1
    )                                                            # (B, S+1)
    emb = jnp.take(params["emb"], sos_y_padded, axis=0)          # (B, S+1, V)
    decoder_out = pallas_decoder_conv(emb, params["conv_w"])     # (B, S+1, V)

    boundary = jnp.stack(
        [jnp.zeros((B,), jnp.int32), jnp.zeros((B,), jnp.int32),
         y_lens.astype(jnp.int32), x_lens.astype(jnp.int32)], axis=1
    )

    # ---- simple (smoothed) rnnt loss with grads ----
    px, py = get_rnnt_logprobs_smoothed(
        decoder_out, encoder_out, y_padded, blank_id, lm_scale, am_scale, boundary
    )
    scores, vjp_fn = jax.vjp(
        lambda a, b: mutual_information_scores(a, b, y_lens, x_lens), px, py
    )
    px_grad, py_grad = vjp_fn(jnp.ones_like(scores))
    simple_loss = -jnp.sum(scores)                               # reduction="sum"

    # ---- pruning ----
    ranges = get_rnnt_prune_ranges(px_grad, py_grad, boundary, prune_range)

    # ---- pruned joiner (Pallas: tanh + bf16 MXU matmul + fused gather/lse) ----
    swt = jnp.concatenate(
        [y_padded, jnp.full((B, 1), blank_id, y_padded.dtype)], axis=1
    )                                                            # (B, S+1)
    sym_logit, blank_logit, lse = pallas_pruned_joiner(
        encoder_out, decoder_out, ranges, swt,
        params["join_w"].astype(jnp.bfloat16), params["join_b"], blank_id,
    )

    # ---- pruned rnnt loss ----
    px_p, py_p = assemble_pruned_logprobs(
        sym_logit - lse, blank_logit - lse, ranges, boundary, S
    )
    pruned_scores = mutual_information_scores(px_p, py_p, y_lens, x_lens)
    pruned_loss = -jnp.sum(pruned_scores)                        # reduction="sum"

    return simple_loss, pruned_loss


def init_params(key, feat_dim, vocab_size, blank_id):
    ks = jax.random.split(key, 6)
    enc_w = jax.random.normal(ks[0], (feat_dim, vocab_size), jnp.float32) / jnp.sqrt(feat_dim)
    enc_b = 0.1 * jax.random.normal(ks[1], (vocab_size,), jnp.float32)
    emb = 0.5 * jax.random.normal(ks[2], (vocab_size, vocab_size), jnp.float32)
    emb = emb.at[blank_id].set(0.0)              # nn.Embedding padding_idx=blank_id
    conv_w = 0.5 * jax.random.normal(ks[3], (2, vocab_size), jnp.float32)  # [tap, channel]
    join_w = jax.random.normal(ks[4], (vocab_size, vocab_size), jnp.float32) / jnp.sqrt(vocab_size)
    join_b = 0.1 * jax.random.normal(ks[5], (vocab_size,), jnp.float32)
    return dict(enc_w=enc_w, enc_b=enc_b, emb=emb, conv_w=conv_w,
                join_w=join_w, join_b=join_b)


if __name__ == "__main__":
    key = jax.random.PRNGKey(0)
    kp, kx, ky = jax.random.split(key, 3)

    B, T, F, V, S = 2, 8, 16, 16, 4        # batch, frames, feat, vocab, max labels
    prune_range = 3
    blank_id = 0

    params = init_params(kp, F, V, blank_id)

    x = jax.random.normal(kx, (B, T, F), jnp.float32)
    x_lens = jnp.array([8, 6], jnp.int32)
    y_lens = jnp.array([4, 3], jnp.int32)
    y_raw = jax.random.randint(ky, (B, S), 1, V)                 # labels in [1, V-1]
    y_padded = jnp.where(jnp.arange(S)[None, :] < y_lens[:, None], y_raw, 0).astype(jnp.int32)

    assert bool(jnp.all(x_lens > 0))

    simple_loss, pruned_loss = transducer_forward(
        params, x, x_lens, y_padded, y_lens,
        prune_range=prune_range, am_scale=0.0, lm_scale=0.0,
    )
    jax.block_until_ready((simple_loss, pruned_loss))
    print("simple_loss =", float(simple_loss), " pruned_loss =", float(pruned_loss))
    print("KERNEL_OK")
</pallas_src>

<mosaic_0001>
module attributes {stable_mosaic.version = 11 : i64} {
  func.func @_linear_kernel(%arg0: i32, %arg1: memref<16x16xbf16, #tpu.memory_space<vmem>>, %arg2: memref<16x16xbf16, #tpu.memory_space<vmem>>, %arg3: memref<1x16xf32, #tpu.memory_space<vmem>>, %arg4: memref<16x16xf32, #tpu.memory_space<vmem>>) attributes {dimension_semantics = [#tpu.dimension_semantics<parallel>], iteration_bounds = array<i64: 1>, scalar_prefetch = 0 : i64, scratch_operands = 0 : i64, tpu.core_type = #tpu.core_type<tc>, window_params = [{transform_indices = @transform_0, window_bounds = array<i64: 16, 16>}, {pipeline_mode = #tpu.pipeline_mode<synchronous>, transform_indices = @transform_1, window_bounds = array<i64: 16, 16>}, {pipeline_mode = #tpu.pipeline_mode<synchronous>, transform_indices = @transform_2, window_bounds = array<i64: 1, 16>}, {transform_indices = @transform_3, window_bounds = array<i64: 16, 16>}]} {
    %c0 = arith.constant 0 : index
    %c0_0 = arith.constant 0 : index
    %0 = vector.load %arg1[%c0, %c0_0] : memref<16x16xbf16, #tpu.memory_space<vmem>>, vector<16x16xbf16>
    %c0_1 = arith.constant 0 : index
    %c0_2 = arith.constant 0 : index
    %1 = vector.load %arg2[%c0_1, %c0_2] : memref<16x16xbf16, #tpu.memory_space<vmem>>, vector<16x16xbf16>
    %cst = arith.constant dense<0.000000e+00> : vector<16x16xf32>
    %2 = tpu.matmul %0, %1, %cst {dimension_numbers = #tpu.dot_dimension_numbers<[1], [0], [0], [1], [0, 0, 1, 1], [], []>} : vector<16x16xbf16>, vector<16x16xbf16>, vector<16x16xf32> -> vector<16x16xf32>
    %c0_3 = arith.constant 0 : index
    %c0_4 = arith.constant 0 : index
    %3 = vector.load %arg3[%c0_3, %c0_4] : memref<1x16xf32, #tpu.memory_space<vmem>>, vector<1x16xf32>
    %4 = vector.broadcast %3 : vector<1x16xf32> to vector<16x16xf32>
    %5 = arith.addf %2, %4 : vector<16x16xf32>
    %c0_5 = arith.constant 0 : index
    %c0_6 = arith.constant 0 : index
    %6 = vector.load %arg4[%c0_5, %c0_6] : memref<16x16xf32, #tpu.memory_space<vmem>>, vector<16x16xf32>
    tpu.vector_store %arg4[%c0_5, %c0_6], %5 {strides = array<i32>} : memref<16x16xf32, #tpu.memory_space<vmem>>, vector<16x16xf32>,
    return
  }
  func.func @transform_0(%arg0: i32) -> (i32, i32) {
    %c0_i32 = arith.constant 0 : i32
    %c0_i32_0 = arith.constant 0 : i32
    return %arg0, %c0_i32 : i32, i32
  }
  func.func @transform_1(%arg0: i32) -> (i32, i32) {
    %c0_i32 = arith.constant 0 : i32
    %c0_i32_0 = arith.constant 0 : i32
    %c0_i32_1 = arith.constant 0 : i32
    return %c0_i32, %c0_i32_0 : i32, i32
  }
  func.func @transform_2(%arg0: i32) -> (i32, i32) {
    %c0_i32 = arith.constant 0 : i32
    %c0_i32_0 = arith.constant 0 : i32
    %c0_i32_1 = arith.constant 0 : i32
    return %c0_i32, %c0_i32_0 : i32, i32
  }
  func.func @transform_3(%arg0: i32) -> (i32, i32) {
    %c0_i32 = arith.constant 0 : i32
    %c0_i32_0 = arith.constant 0 : i32
    return %arg0, %c0_i32 : i32, i32
  }
}

module attributes {stable_mosaic.version = 11 : i64} {
  func.func @_dec_conv_kernel(%arg0: i32, %arg1: memref<2x5x16xf32, #tpu.memory_space<vmem>>, %arg2: memref<2x16xf32, #tpu.memory_space<vmem>>, %arg3: memref<2x5x16xf32, #tpu.memory_space<vmem>>) attributes {dimension_semantics = [#tpu.dimension_semantics<parallel>], iteration_bounds = array<i64: 1>, scalar_prefetch = 0 : i64, scratch_operands = 0 : i64, tpu.core_type = #tpu.core_type<tc>, window_params = [{transform_indices = @transform_0, window_bounds = array<i64: 2, 5, 16>}, {pipeline_mode = #tpu.pipeline_mode<synchronous>, transform_indices = @transform_1, window_bounds = array<i64: 2, 16>}, {transform_indices = @transform_2, window_bounds = array<i64: 2, 5, 16>}]} {
    %c0 = arith.constant 0 : index
    %c0_0 = arith.constant 0 : index
    %c0_1 = arith.constant 0 : index
    %0 = vector.load %arg1[%c0, %c0_0, %c0_1] : memref<2x5x16xf32, #tpu.memory_space<vmem>>, vector<2x5x16xf32>
    %c0_2 = arith.constant 0 : index
    %c0_3 = arith.constant 0 : index
    %1 = vector.load %arg2[%c0_2, %c0_3] : memref<2x16xf32, #tpu.memory_space<vmem>>, vector<2x16xf32>
    %cst = arith.constant 0.000000e+00 : f32
    %2 = vector.broadcast %cst : f32 to vector<2x1x16xf32>
    %3 = vector.extract_strided_slice %0 {offsets = [0, 0, 0], sizes = [2, 4, 16], strides = [1, 1, 1]} : vector<2x5x16xf32> to vector<2x4x16xf32>
    %4 = tpu.concatenate %2, %3 in 1 : vector<2x1x16xf32>, vector<2x4x16xf32> -> vector<2x5x16xf32>
    %5 = vector.extract_strided_slice %1 {offsets = [0, 0], sizes = [1, 16], strides = [1, 1]} : vector<2x16xf32> to vector<1x16xf32>
    %6 = vector.shape_cast %5 : vector<1x16xf32> to vector<16xf32>
    %7 = vector.shape_cast %6 : vector<16xf32> to vector<1x1x16xf32>
    %8 = vector.broadcast %7 : vector<1x1x16xf32> to vector<2x5x16xf32>
    %9 = arith.mulf %4, %8 : vector<2x5x16xf32>
    %10 = vector.extract_strided_slice %1 {offsets = [1, 0], sizes = [1, 16], strides = [1, 1]} : vector<2x16xf32> to vector<1x16xf32>
    %11 = vector.shape_cast %10 : vector<1x16xf32> to vector<16xf32>
    %12 = vector.shape_cast %11 : vector<16xf32> to vector<1x1x16xf32>
    %13 = vector.broadcast %12 : vector<1x1x16xf32> to vector<2x5x16xf32>
    %14 = arith.mulf %0, %13 : vector<2x5x16xf32>
    %15 = arith.addf %9, %14 : vector<2x5x16xf32>
    %cst_4 = arith.constant 0.000000e+00 : f32
    %16 = vector.broadcast %cst_4 : f32 to vector<2x5x16xf32>
    %17 = arith.maximumf %15, %16 : vector<2x5x16xf32>
    %c0_5 = arith.constant 0 : index
    %c0_6 = arith.constant 0 : index
    %c0_7 = arith.constant 0 : index
    %18 = vector.load %arg3[%c0_5, %c0_6, %c0_7] : memref<2x5x16xf32, #tpu.memory_space<vmem>>, vector<2x5x16xf32>
    tpu.vector_store %arg3[%c0_5, %c0_6, %c0_7], %17 {strides = array<i32>} : memref<2x5x16xf32, #tpu.memory_space<vmem>>, vector<2x5x16xf32>,
    return
  }
  func.func @transform_0(%arg0: i32) -> (i32, i32, i32) {
    %c0_i32 = arith.constant 0 : i32
    %c0_i32_0 = arith.constant 0 : i32
    %c0_i32_1 = arith.constant 0 : i32
    return %arg0, %c0_i32, %c0_i32_0 : i32, i32, i32
  }
  func.func @transform_1(%arg0: i32) -> (i32, i32) {
    %c0_i32 = arith.constant 0 : i32
    %c0_i32_0 = arith.constant 0 : i32
    %c0_i32_1 = arith.constant 0 : i32
    return %c0_i32, %c0_i32_0 : i32, i32
  }
  func.func @transform_2(%arg0: i32) -> (i32, i32, i32) {
    %c0_i32 = arith.constant 0 : i32
    %c0_i32_0 = arith.constant 0 : i32
    %c0_i32_1 = arith.constant 0 : i32
    return %arg0, %c0_i32, %c0_i32_0 : i32, i32, i32
  }
}

module attributes {stable_mosaic.version = 11 : i64} {
  func.func @_smooth_normalizer_kernel(%arg0: i32, %arg1: i32, %arg2: memref<1x5x16xf32, #tpu.memory_space<vmem>>, %arg3: memref<1x16x128xf32, #tpu.memory_space<vmem>>, %arg4: memref<1x5x128xf32, #tpu.memory_space<vmem>>) attributes {dimension_semantics = [#tpu.dimension_semantics<parallel>, #tpu.dimension_semantics<parallel>], iteration_bounds = array<i64: 2, 1>, scalar_prefetch = 0 : i64, scratch_operands = 0 : i64, tpu.core_type = #tpu.core_type<tc>, window_params = [{transform_indices = @transform_0, window_bounds = array<i64: 1, 5, 16>}, {transform_indices = @transform_1, window_bounds = array<i64: 1, 16, 128>}, {transform_indices = @transform_2, window_bounds = array<i64: 1, 5, 128>}]} {
    %c0 = arith.constant 0 : index
    %c0_0 = arith.constant 0 : index
    %c0_1 = arith.constant 0 : index
    %0 = vector.load %arg2[%c0, %c0_0, %c0_1] : memref<1x5x16xf32, #tpu.memory_space<vmem>>, vector<1x5x16xf32>
    %1 = vector.shape_cast %0 : vector<1x5x16xf32> to vector<5x16xf32>
    %c0_2 = arith.constant 0 : index
    %c0_3 = arith.constant 0 : index
    %c0_4 = arith.constant 0 : index
    %2 = vector.load %arg3[%c0_2, %c0_3, %c0_4] : memref<1x16x128xf32, #tpu.memory_space<vmem>>, vector<1x16x128xf32>
    %3 = vector.shape_cast %2 : vector<1x16x128xf32> to vector<16x128xf32>
    %cst = arith.constant dense<0xFF800000> : vector<5xf32>
    %4 = vector.multi_reduction <maximumf>, %1, %cst [1] : vector<5x16xf32> to vector<5xf32>
    %5 = vector.shape_cast %4 : vector<5xf32> to vector<5x1xf32>
    %cst_5 = arith.constant dense<0xFF800000> : vector<128xf32>
    %6 = vector.multi_reduction <maximumf>, %3, %cst_5 [0] : vector<16x128xf32> to vector<128xf32>
    %7 = vector.shape_cast %6 : vector<128xf32> to vector<1x128xf32>
    %8 = vector.broadcast %5 : vector<5x1xf32> to vector<5x16xf32>
    %9 = arith.subf %1, %8 : vector<5x16xf32>
    %10 = math.exp %9 : vector<5x16xf32>
    %11 = vector.broadcast %7 : vector<1x128xf32> to vector<16x128xf32>
    %12 = arith.subf %3, %11 : vector<16x128xf32>
    %13 = math.exp %12 : vector<16x128xf32>
    %cst_6 = arith.constant dense<0.000000e+00> : vector<5x128xf32>
    %14 = tpu.matmul %10, %13, %cst_6 {dimension_numbers = #tpu.dot_dimension_numbers<[1], [0], [0], [1], [0, 0, 1, 1], [], []>} : vector<5x16xf32>, vector<16x128xf32>, vector<5x128xf32> -> vector<5x128xf32>
    %cst_7 = arith.constant 1.17549435E-38 : f32
    %15 = vector.broadcast %cst_7 : f32 to vector<5x128xf32>
    %16 = arith.addf %14, %15 : vector<5x128xf32>
    %17 = math.log %16 : vector<5x128xf32>
    %18 = vector.broadcast %5 : vector<5x1xf32> to vector<5x128xf32>
    %19 = arith.addf %17, %18 : vector<5x128xf32>
    %20 = vector.broadcast %7 : vector<1x128xf32> to vector<5x128xf32>
    %21 = arith.addf %19, %20 : vector<5x128xf32>
    %c0_8 = arith.constant 0 : index
    %c0_9 = arith.constant 0 : index
    %c0_10 = arith.constant 0 : index
    %22 = vector.load %arg4[%c0_8, %c0_9, %c0_10] : memref<1x5x128xf32, #tpu.memory_space<vmem>>, vector<1x5x128xf32>
    %23 = vector.shape_cast %22 : vector<1x5x128xf32> to vector<5x128xf32>
    %24 = vector.shape_cast %21 : vector<5x128xf32> to vector<1x5x128xf32>
    tpu.vector_store %arg4[%c0_8, %c0_9, %c0_10], %24 {strides = array<i32>} : memref<1x5x128xf32, #tpu.memory_space<vmem>>, vector<1x5x128xf32>,
    return
  }
  func.func @transform_0(%arg0: i32, %arg1: i32) -> (i32, i32, i32) {
    %c0_i32 = arith.constant 0 : i32
    %c0_i32_0 = arith.constant 0 : i32
    %c0_i32_1 = arith.constant 0 : i32
    return %arg0, %c0_i32, %c0_i32_0 : i32, i32, i32
  }
  func.func @transform_1(%arg0: i32, %arg1: i32) -> (i32, i32, i32) {
    %c0_i32 = arith.constant 0 : i32
    %c0_i32_0 = arith.constant 0 : i32
    return %arg0, %c0_i32, %arg1 : i32, i32, i32
  }
  func.func @transform_2(%arg0: i32, %arg1: i32) -> (i32, i32, i32) {
    %c0_i32 = arith.constant 0 : i32
    %c0_i32_0 = arith.constant 0 : i32
    return %arg0, %c0_i32, %arg1 : i32, i32, i32
  }
}

module attributes {stable_mosaic.version = 11 : i64} {
  func.func @_pruned_joiner_kernel(%arg0: i32, %arg1: i32, %arg2: memref<1x8x16xbf16, #tpu.memory_space<vmem>>, %arg3: memref<1x3x8x16xbf16, #tpu.memory_space<vmem>>, %arg4: memref<1x3x8x1xi32, #tpu.memory_space<vmem>>, %arg5: memref<16x16xbf16, #tpu.memory_space<vmem>>, %arg6: memref<1x16xf32, #tpu.memory_space<vmem>>, %arg7: memref<1x3x8x1xf32, #tpu.memory_space<vmem>>, %arg8: memref<1x3x8x1xf32, #tpu.memory_space<vmem>>, %arg9: memref<1x3x8x1xf32, #tpu.memory_space<vmem>>) attributes {dimension_semantics = [#tpu.dimension_semantics<parallel>, #tpu.dimension_semantics<parallel>], iteration_bounds = array<i64: 2, 1>, scalar_prefetch = 0 : i64, scratch_operands = 0 : i64, tpu.core_type = #tpu.core_type<tc>, window_params = [{transform_indices = @transform_0, window_bounds = array<i64: 1, 8, 16>}, {transform_indices = @transform_1, window_bounds = array<i64: 1, 3, 8, 16>}, {transform_indices = @transform_2, window_bounds = array<i64: 1, 3, 8, 1>}, {pipeline_mode = #tpu.pipeline_mode<synchronous>, transform_indices = @transform_3, window_bounds = array<i64: 16, 16>}, {pipeline_mode = #tpu.pipeline_mode<synchronous>, transform_indices = @transform_4, window_bounds = array<i64: 1, 16>}, {transform_indices = @transform_5, window_bounds = array<i64: 1, 3, 8, 1>}, {transform_indices = @transform_6, window_bounds = array<i64: 1, 3, 8, 1>}, {transform_indices = @transform_7, window_bounds = array<i64: 1, 3, 8, 1>}]} {
    %c0 = arith.constant 0 : index
    %c0_0 = arith.constant 0 : index
    %c0_1 = arith.constant 0 : index
    %c0_2 = arith.constant 0 : index
    %0 = vector.load %arg3[%c0, %c0_0, %c0_1, %c0_2] : memref<1x3x8x16xbf16, #tpu.memory_space<vmem>>, vector<1x3x8x16xbf16>
    %1 = vector.shape_cast %0 : vector<1x3x8x16xbf16> to vector<3x8x16xbf16>
    %c0_3 = arith.constant 0 : index
    %c0_4 = arith.constant 0 : index
    %c0_5 = arith.constant 0 : index
    %2 = vector.load %arg2[%c0_3, %c0_4, %c0_5] : memref<1x8x16xbf16, #tpu.memory_space<vmem>>, vector<1x8x16xbf16>
    %3 = vector.shape_cast %2 : vector<1x8x16xbf16> to vector<8x16xbf16>
    %4 = vector.shape_cast %3 : vector<8x16xbf16> to vector<1x8x16xbf16>
    %5 = vector.broadcast %4 : vector<1x8x16xbf16> to vector<3x8x16xbf16>
    %6 = arith.addf %1, %5 : vector<3x8x16xbf16>
    %7 = arith.extf %6 : vector<3x8x16xbf16> to vector<3x8x16xf32>
    %8 = math.tanh %7 : vector<3x8x16xf32>
    %9 = arith.truncf %8 : vector<3x8x16xf32> to vector<3x8x16xbf16>
    %10 = vector.shape_cast %9 : vector<3x8x16xbf16> to vector<24x16xbf16>
    %c0_6 = arith.constant 0 : index
    %c0_7 = arith.constant 0 : index
    %11 = vector.load %arg5[%c0_6, %c0_7] : memref<16x16xbf16, #tpu.memory_space<vmem>>, vector<16x16xbf16>
    %cst = arith.constant dense<0.000000e+00> : vector<24x16xf32>
    %12 = tpu.matmul %10, %11, %cst {dimension_numbers = #tpu.dot_dimension_numbers<[1], [0], [0], [1], [0, 0, 1, 1], [], []>} : vector<24x16xbf16>, vector<16x16xbf16>, vector<24x16xf32> -> vector<24x16xf32>
    %c0_8 = arith.constant 0 : index
    %c0_9 = arith.constant 0 : index
    %13 = vector.load %arg6[%c0_8, %c0_9] : memref<1x16xf32, #tpu.memory_space<vmem>>, vector<1x16xf32>
    %14 = vector.broadcast %13 : vector<1x16xf32> to vector<24x16xf32>
    %15 = arith.addf %12, %14 : vector<24x16xf32>
    %cst_10 = arith.constant dense<0xFF800000> : vector<24xf32>
    %16 = vector.multi_reduction <maximumf>, %15, %cst_10 [1] : vector<24x16xf32> to vector<24xf32>
    %17 = vector.shape_cast %16 : vector<24xf32> to vector<24x1xf32>
    %18 = vector.broadcast %17 : vector<24x1xf32> to vector<24x16xf32>
    %19 = arith.subf %15, %18 : vector<24x16xf32>
    %20 = math.exp %19 : vector<24x16xf32>
    %cst_11 = arith.constant dense<0.000000e+00> : vector<24xf32>
    %21 = vector.multi_reduction <add>, %20, %cst_11 [1] : vector<24x16xf32> to vector<24xf32>
    %22 = vector.shape_cast %21 : vector<24xf32> to vector<24x1xf32>
    %23 = math.log %22 : vector<24x1xf32>
    %24 = arith.addf %17, %23 : vector<24x1xf32>
    %25 = tpu.iota {dimensions = array<i32: 1>} : vector<24x16xi32>
    %c0_12 = arith.constant 0 : index
    %c0_13 = arith.constant 0 : index
    %c0_14 = arith.constant 0 : index
    %c0_15 = arith.constant 0 : index
    %26 = vector.load %arg4[%c0_12, %c0_13, %c0_14, %c0_15] : memref<1x3x8x1xi32, #tpu.memory_space<vmem>>, vector<1x3x8x1xi32>
    %27 = vector.shape_cast %26 : vector<1x3x8x1xi32> to vector<3x8x1xi32>
    %28 = vector.shape_cast %27 : vector<3x8x1xi32> to vector<24x1xi32>
    %29 = vector.broadcast %28 : vector<24x1xi32> to vector<24x16xi32>
    %30 = arith.cmpi eq, %25, %29 : vector<24x16xi32>
    %cst_16 = arith.constant 0.000000e+00 : f32
    %31 = vector.broadcast %cst_16 : f32 to vector<24x16xf32>
    %32 = arith.select %30, %15, %31 : vector<24x16xi1>, vector<24x16xf32>
    %cst_17 = arith.constant dense<0.000000e+00> : vector<24xf32>
    %33 = vector.multi_reduction <add>, %32, %cst_17 [1] : vector<24x16xf32> to vector<24xf32>
    %34 = vector.shape_cast %33 : vector<24xf32> to vector<24x1xf32>
    %35 = vector.extract_strided_slice %15 {offsets = [0, 0], sizes = [24, 1], strides = [1, 1]} : vector<24x16xf32> to vector<24x1xf32>
    %36 = vector.shape_cast %34 : vector<24x1xf32> to vector<3x8x1xf32>
    %c0_18 = arith.constant 0 : index
    %c0_19 = arith.constant 0 : index
    %c0_20 = arith.constant 0 : index
    %c0_21 = arith.constant 0 : index
    %37 = vector.load %arg7[%c0_18, %c0_19, %c0_20, %c0_21] : memref<1x3x8x1xf32, #tpu.memory_space<vmem>>, vector<1x3x8x1xf32>
    %38 = vector.shape_cast %37 : vector<1x3x8x1xf32> to vector<3x8x1xf32>
    %39 = vector.shape_cast %36 : vector<3x8x1xf32> to vector<1x3x8x1xf32>
    tpu.vector_store %arg7[%c0_18, %c0_19, %c0_20, %c0_21], %39 {strides = array<i32>} : memref<1x3x8x1xf32, #tpu.memory_space<vmem>>, vector<1x3x8x1xf32>,
    %40 = vector.shape_cast %35 : vector<24x1xf32> to vector<3x8x1xf32>
    %c0_22 = arith.constant 0 : index
    %c0_23 = arith.constant 0 : index
    %c0_24 = arith.constant 0 : index
    %c0_25 = arith.constant 0 : index
    %41 = vector.load %arg8[%c0_22, %c0_23, %c0_24, %c0_25] : memref<1x3x8x1xf32, #tpu.memory_space<vmem>>, vector<1x3x8x1xf32>
    %42 = vector.shape_cast %41 : vector<1x3x8x1xf32> to vector<3x8x1xf32>
    %43 = vector.shape_cast %40 : vector<3x8x1xf32> to vector<1x3x8x1xf32>
    tpu.vector_store %arg8[%c0_22, %c0_23, %c0_24, %c0_25], %43 {strides = array<i32>} : memref<1x3x8x1xf32, #tpu.memory_space<vmem>>, vector<1x3x8x1xf32>,
    %44 = vector.shape_cast %24 : vector<24x1xf32> to vector<3x8x1xf32>
    %c0_26 = arith.constant 0 : index
    %c0_27 = arith.constant 0 : index
    %c0_28 = arith.constant 0 : index
    %c0_29 = arith.constant 0 : index
    %45 = vector.load %arg9[%c0_26, %c0_27, %c0_28, %c0_29] : memref<1x3x8x1xf32, #tpu.memory_space<vmem>>, vector<1x3x8x1xf32>
    %46 = vector.shape_cast %45 : vector<1x3x8x1xf32> to vector<3x8x1xf32>
    %47 = vector.shape_cast %44 : vector<3x8x1xf32> to vector<1x3x8x1xf32>
    tpu.vector_store %arg9[%c0_26, %c0_27, %c0_28, %c0_29], %47 {strides = array<i32>} : memref<1x3x8x1xf32, #tpu.memory_space<vmem>>, vector<1x3x8x1xf32>,
    return
  }
  func.func @transform_0(%arg0: i32, %arg1: i32) -> (i32, i32, i32) {
    %c0_i32 = arith.constant 0 : i32
    %c0_i32_0 = arith.constant 0 : i32
    return %arg0, %arg1, %c0_i32 : i32, i32, i32
  }
  func.func @transform_1(%arg0: i32, %arg1: i32) -> (i32, i32, i32, i32) {
    %c0_i32 = arith.constant 0 : i32
    %c0_i32_0 = arith.constant 0 : i32
    %c0_i32_1 = arith.constant 0 : i32
    return %arg0, %c0_i32, %arg1, %c0_i32_0 : i32, i32, i32, i32
  }
  func.func @transform_2(%arg0: i32, %arg1: i32) -> (i32, i32, i32, i32) {
    %c0_i32 = arith.constant 0 : i32
    %c0_i32_0 = arith.constant 0 : i32
    %c0_i32_1 = arith.constant 0 : i32
    return %arg0, %c0_i32, %arg1, %c0_i32_0 : i32, i32, i32, i32
  }
  func.func @transform_3(%arg0: i32, %arg1: i32) -> (i32, i32) {
    %c0_i32 = arith.constant 0 : i32
    %c0_i32_0 = arith.constant 0 : i32
    %c0_i32_1 = arith.constant 0 : i32
    return %c0_i32, %c0_i32_0 : i32, i32
  }
  func.func @transform_4(%arg0: i32, %arg1: i32) -> (i32, i32) {
    %c0_i32 = arith.constant 0 : i32
    %c0_i32_0 = arith.constant 0 : i32
    %c0_i32_1 = arith.constant 0 : i32
    return %c0_i32, %c0_i32_0 : i32, i32
  }
  func.func @transform_5(%arg0: i32, %arg1: i32) -> (i32, i32, i32, i32) {
    %c0_i32 = arith.constant 0 : i32
    %c0_i32_0 = arith.constant 0 : i32
    %c0_i32_1 = arith.constant 0 : i32
    return %arg0, %c0_i32, %arg1, %c0_i32_0 : i32, i32, i32, i32
  }
  func.func @transform_6(%arg0: i32, %arg1: i32) -> (i32, i32, i32, i32) {
    %c0_i32 = arith.constant 0 : i32
    %c0_i32_0 = arith.constant 0 : i32
    %c0_i32_1 = arith.constant 0 : i32
    return %arg0, %c0_i32, %arg1, %c0_i32_0 : i32, i32, i32, i32
  }
  func.func @transform_7(%arg0: i32, %arg1: i32) -> (i32, i32, i32, i32) {
    %c0_i32 = arith.constant 0 : i32
    %c0_i32_0 = arith.constant 0 : i32
    %c0_i32_1 = arith.constant 0 : i32
    return %arg0, %c0_i32, %arg1, %c0_i32_0 : i32, i32, i32, i32
  }
}

</mosaic_0001>

<bundles_post_ra>
// kernel: transducer_forward.5
= control target key start
LH: loop header
LB: loop body
LE: loop exit
PB: predicated region body
PF: predicated region fallthrough
CT: control target
= control target key end

     0   :  { %v23_v0 = vlaneseq  ;;  %vm20_vm0 = vcmask 1040384   ;;  %vm39_vm1 = vcmask 126976   ;;  %s76_s0 = inlined_call_operand.vmem [shape: f32[2,5,16], index: 0, kind: input, shape index: {}]   ;;  %s77_s1 = inlined_call_operand.vmem [shape: f32[2,16], index: 1, kind: input, shape index: {}]   ;;  %s78_s2 = inlined_call_operand.vmem [shape: f32[2,5,16], index: 2, kind: output, shape index: {}]  }
   0x1   :  { %v11_v1 = vld [vmem:[%s76_s0] sm:$0x1f]  ;;  %v12_v2 = vld [vmem:[%s76_s0 + $0x8] sm:$0x1f] }
   0x2   :  { %v16_v3 = vrot.slane %v11_v1, 7  ;;  %v24_v4 = vshrl.u32 %v23_v0, 7  ;;  %v17_v5 = vrot.slane %v12_v2, 7  ;;  %v13_v6 = vld [vmem:[%s77_s1] sm:$0x3] }
   0x4   :  { %v25_v7 = vsub.s32 0, %v24_v4  ;;  %v31_v8 = vsub.s32 1, %v24_v4  ;;  %v21_v9 = vsel %vm20_vm0, 0.0, %v16_v3  ;;  %v22_v10 = vsel %vm20_vm0, 0.0, %v17_v5 }
   0x6   :  { %v26_v11 = vrot.slane %v13_v6, %v25_v7  ;;  %v32_v12 = vrot.slane %v13_v6, %v31_v8 }
   0x8   :  { %v27_v13 = vmul.f32 %v26_v11, %v21_v9  ;;  %v33_v14 = vmul.f32 %v32_v12, %v11_v1  ;;  %v28_v15 = vmul.f32 %v26_v11, %v22_v10  ;;  %v34_v16 = vmul.f32 %v32_v12, %v12_v2 }
   0xa   :  { %v35_v17 = vadd.f32 %v33_v14, %v27_v13  ;;  %v36_v18 = vadd.f32 %v34_v16, %v28_v15 }
   0xc   :  { %v37_v19 = vmax.f32 %v35_v17, 0.0  ;;  %v38_v20 = vmax.f32 %v36_v18, 0.0 }
   0xe   :  { %40 = vst.msk [vmem:[%s78_s2] sm:$0x1f] %vm39_vm1, %v37_v19  ;;  %41 = vst.msk [vmem:[%s78_s2 + $0x8] sm:$0x1f] %vm39_vm1, %v38_v20 }

// kernel: transducer_forward.6
= control target key start
LH: loop header
LB: loop body
LE: loop exit
PB: predicated region body
PF: predicated region fallthrough
CT: control target
= control target key end

     0   :  { %s484_s9 = smov 0   ;;  %s486_s10 = smov 0   ;;  %s528_s0 = inlined_call_operand.vmem [shape: f32[2,5,16], index: 0, kind: input, shape index: {}]   ;;  %s529_s1 = inlined_call_operand.vmem [shape: f32[2,16,128], index: 1, kind: input, shape index: {}]   ;;  %s530_s2 = inlined_call_operand.vmem [shape: f32[2,5,128], index: 2, kind: output, shape index: {}]  }
   0x1   :  { %s488_s11 = smov 0  }
   0x2 LB: > { %s24_s12 = sadd.s32 1, %s460_s10  ;;  %p385_p0 = scmp.ge.s32.totalorder %s464_s11, 1  ;;  %s464_s11 = sphi %s488_s11, %s12_s11   ;;  %s460_s10 = sphi %s486_s10, %s532_s10   ;;  %s456_s9 = sphi %s484_s9, %s531_s9  }
   0x3   : > { %p26_p1 = scmp.ge.s32.totalorder %s24_s12, 2  ;;  %p140_p2 = scmp.lt.s32.totalorder %s464_s11, 3 }
   0x5   : > { %s534_s12 = smov (%p26_p1, %s24_s12), 0  ;;  %p141_p3 = pnand %p385_p0, %p140_p2 }
   0x6   : > { %p171_p4 = scmp.lt.s32.totalorder (!%p141_p3), %s456_s9, 1  ;;  %vm193_vm0 = vcmask (!%p141_p3), 126976   ;;  %v466_v15 = vmov (!%p141_p3), 0.0|0.0   ;;  %vm467_vm1 = vmmov (!%p141_p3), 0   ;;  %v468_v16 = vmov (!%p141_p3), 0.0  }
   0x7   : > { %144 = sbr.rel (%p141_p3) target bundleno = 408 (0x198), region = 28  ;;  %404 = vmatprep.subr.bf16.mxu0 (!%p141_p3), %v466_v15  ;;  %401 = vmatprep.mubr.msk.f32.mxu0 (!%p141_p3), %vm467_vm1, %v468_v16  ;;  %vm213_vm2 = vcmask (!%p141_p3), 130048  }
   0xe   : > { %s536_s9 = smov (!%p171_p4, %s456_s9), 1 }
   0xf   : > { %s386_s13 = sshll.u32 %s536_s9, 3  ;;  %s393_s14 = sshll.u32 %s536_s9, 4 }
  0x10   : > { %s174_s17 = scalar_lea.vmem %s528_s0, %s386_s13  ;;  %s182_s20 = scalar_lea.vmem %s529_s1, %s393_s14 }
  0x11   : > { %v190_v0 = vld [vmem:[%s174_s17] sm:$0x1f]  ;;  %v192_v2 = vld [vmem:[%s182_s20 + $0x8] sm:$0xff]  ;;  %s189_s23 = scalar_lea.vmem %s530_s2, %s386_s13 }
  0x12   : > { %v191_v1 = vld [vmem:[%s182_s20] sm:$0xff]  ;;  %v194_v3 = vsel %vm193_vm0, %v190_v0, -inf }
  0x13   : > { %v197_v4 = vmax.f32 %v191_v1, %v192_v2  ;;  %195 = vmax.xlane.f32.xlu0 %v194_v3 }
  0x15   : > { %v198_v5 = vrot.slane %v197_v4, 4 }
  0x17   : > { %v199_v6 = vmax.f32 %v197_v4, %v198_v5 }
  0x19   : > { %v200_v7 = vrot.slane %v199_v6, 2 }
  0x1b   : > { %v201_v8 = vmax.f32 %v199_v6, %v200_v7 }
  0x1d   : > { %v202_v9 = vrot.slane %v201_v8, 1 }
  0x1f   : > { %v203_v10 = vmax.f32 %v201_v8, %v202_v9 }
  0x21   : > { %v207_v11 = vsub.f32 %v191_v1, %v203_v10  ;;  %v208_v12 = vsub.f32 %v192_v2, %v203_v10 }
  0x23   : > { %v209_v13 = vmul.f32 1.442695, %v207_v11  ;;  %v211_v14 = vmul.f32 1.442695, %v208_v12 }
  0x25   : > { %434 = vpow2.f32 %v209_v13 }
  0x26   : > { %436 = vpow2.f32 %v211_v14 }
  0x2f   : > { %v435_v17 = vpop.eup %434 }
  0x30   : > { %v437_v18 = vpop.eup %436 }
  0x31   : > { %v405_v19 = vpack.c.bf16 %v437_v18, %v435_v17 }
  0x33   : > { %406 = vmatpush3.bf16.msra.mxu0 %v405_v19 }
  0xa0   : > { %v196_v20 = vpop.xlane.xlu0 %195 }
  0xa1   : > { %v204_v21 = vsub.f32 %v190_v0, %v196_v20 }
  0xa3   : > { %v205_v22 = vmul.f32 1.442695, %v204_v21 }
  0xa5   : > { %438 = vpow2.f32 %v205_v22 }
  0xaf   : > { %v439_v23 = vpop.eup %438 }
  0xb0   : > { %402 = vmatmul.mubr.msk.f32.vlgmr.msra.gmra.mrb[0].mxu0 %vm213_vm2, %v439_v23 }
 0x183   : > { %v283_v24 = vpop.f32.mrb[0].mxu0 }
 0x184   : > { %v284_v25 = vadd.f32 1.1754944e-38, %v283_v24  ;;  %v403_v26 = vpop.f32.mrb[1].mxu0 }
 0x186   : > { %440 = vlog2.f32 %v284_v25 }
 0x190   : > { %v441_v27 = vpop.eup %440 }
 0x191   : > { %v288_v28 = vmul.f32 0.6931472, %v441_v27 }
 0x193   : > { %v289_v29 = vadd.f32 %v288_v28, %v196_v20 }
 0x195   : > { %v290_v30 = vadd.f32 %v289_v29, %v203_v10 }
 0x197   : > { %291 = vst [vmem:[%s189_s23] sm:$0x1f] %v290_v30 }
 0x198 PF: > { %s12_s11 = sadd.s32 1, %s464_s11   ;;  %s531_s9 = smov %s460_s10 }
 0x199   : > { %p9_p5 = scmp.ge.s32.totalorder %s12_s11, 4   ;;  %s532_s10 = smov %s534_s12 }
 0x19b   :  { %11 = sbr.rel (!%p9_p5) target bundleno = 2 (0x2), region = 61 }

// kernel: transducer_forward.4
= control target key start
LH: loop header
LB: loop body
LE: loop exit
PB: predicated region body
PF: predicated region fallthrough
CT: control target
= control target key end

     0   :  { %v104_v0 = vmov 0.0   ;;  %vm105_vm0 = vmmov 0   ;;  %vm37_vm1 = vcmask 130048   ;;  %s141_s1 = inlined_call_operand.vmem [shape: bf16[16,16], index: 1, kind: input, shape index: {}]   ;;  %s142_s0 = inlined_call_operand.vmem [shape: bf16[16,16], index: 0, kind: input, shape index: {}]   ;;  %s143_s2 = inlined_call_operand.vmem [shape: f32[1,16], index: 2, kind: input, shape index: {}]   ;;  %s144_s3 = inlined_call_operand.vmem [shape: f32[16,16], index: 3, kind: output, shape index: {}]  }
   0x1   :  { %94 = vmatprep.subr.bf16.mxu0 %v104_v0  ;;  %v102_v1 = vld [vmem:[%s141_s1] sm:$0xff]   ;;  %96 = vmatprep.mubr.msk.bf16.mxu0 %vm105_vm0, %v104_v0 }
   0x2   :  { %v103_v2 = vld [vmem:[%s142_s0] sm:$0xff]   ;;  %95 = vmatpush3.bf16.msra.mxu0 %v102_v1 }
   0x3   :  { %v88_v3 = vld [vmem:[%s143_s2] ss:$0 sm:$0xff] }
   0x5   :  { %97 = vmatmul.mubr.msk.bf16.vlgmr.msra.gmra.mrb[0].mxu0 %vm37_vm1, %v103_v2 }
  0xd8   :  { %v75_v4 = vpop.f32.mrb[0].mxu0 }
  0xd9   :  { %v76_v5 = vadd.f32 %v88_v3, %v75_v4  ;;  %v98_v6 = vpop.f32.mrb[1].mxu0 }
  0xda   :  { %v78_v7 = vpop.f32.mrb[2].mxu0 }
  0xdb   :  { %82 = vst.msk [vmem:[%s144_s3] sm:$0xff] %vm37_vm1, %v76_v5  ;;  %v79_v8 = vadd.f32 %v88_v3, %v78_v7  ;;  %v99_v9 = vpop.f32.mrb[3].mxu0 }
  0xdd   :  { %83 = vst.msk [vmem:[%s144_s3 + $0x8] sm:$0xff] %vm37_vm1, %v79_v8 }

// kernel: custom-call.31
= control target key start
LH: loop header
LB: loop body
LE: loop exit
PB: predicated region body
PF: predicated region fallthrough
CT: control target
= control target key end

     0   :  { %s6_s0 = inlined_call_operand.vmem [shape: f32[8,4,2], index: 0, kind: output, shape index: {}]  }

// kernel: custom-call.38
= control target key start
LH: loop header
LB: loop body
LE: loop exit
PB: predicated region body
PF: predicated region fallthrough
CT: control target
= control target key end

     0   :  { %s6_s0 = inlined_call_operand.vmem [shape: f32[4,2], index: 0, kind: output, shape index: {}]  }

// kernel: custom-call.19
= control target key start
LH: loop header
LB: loop body
LE: loop exit
PB: predicated region body
PF: predicated region fallthrough
CT: control target
= control target key end

     0   :  { %s6_s0 = inlined_call_operand.vmem [shape: f32[2,5], index: 0, kind: output, shape index: {}]  }

// kernel: custom-call.42
= control target key start
LH: loop header
LB: loop body
LE: loop exit
PB: predicated region body
PF: predicated region fallthrough
CT: control target
= control target key end

     0   :  { %s6_s0 = inlined_call_operand.vmem [shape: f32[2], index: 0, kind: output, shape index: {}]  }

// kernel: transducer_forward.7
= control target key start
LH: loop header
LB: loop body
LE: loop exit
PB: predicated region body
PF: predicated region fallthrough
CT: control target
= control target key end

     0   :  { %s933_s24 = smov 0   ;;  %s935_s25 = smov 0   ;;  %s1010_s0 = inlined_call_operand.vmem [shape: bf16[2,8,16], index: 0, kind: input, shape index: {}]   ;;  %s1011_s1 = inlined_call_operand.vmem [shape: bf16[2,3,8,16], index: 1, kind: input, shape index: {}]   ;;  %s1012_s2 = inlined_call_operand.vmem [shape: s32[2,3,8,1], index: 2, kind: input, shape index: {}]   ;;  %s1013_s3 = inlined_call_operand.vmem [shape: bf16[16,16], index: 3, kind: input, shape index: {}]   ;;  %s1014_s4 = inlined_call_operand.vmem [shape: f32[1,16], index: 4, kind: input, shape index: {}]   ;;  %s1015_s5 = inlined_call_operand.vmem [shape: f32[2,3,8,1], index: 5, kind: output, shape index: {0}]   ;;  %s1016_s6 = inlined_call_operand.vmem [shape: f32[2,3,8,1], index: 6, kind: output, shape index: {1}]   ;;  %s1017_s7 = inlined_call_operand.vmem [shape: f32[2,3,8,1], index: 7, kind: output, shape index: {2}]  }
   0x1   :  { %s937_s26 = smov 0  }
   0x2 LB: > { %s30_s27 = sadd.s32 1, %s886_s25  ;;  %p794_p0 = scmp.ge.s32.totalorder %s890_s26, 1  ;;  %s890_s26 = sphi %s937_s26, %s18_s26   ;;  %s886_s25 = sphi %s935_s25, %s1019_s25   ;;  %s882_s24 = sphi %s933_s24, %s1018_s24  }
   0x3   : > { %p32_p1 = scmp.ge.s32.totalorder %s30_s27, 2  ;;  %p294_p2 = scmp.lt.s32.totalorder %s890_s26, 3 }
   0x5   : > { %s1021_s27 = smov (%p32_p1, %s30_s27), 0  ;;  %p295_p3 = pnand %p794_p0, %p294_p2 }
   0x6   : > { %v849_v0 = vld [vmem:[%s1013_s3] sm:$0xff] (!%p295_p3)   ;;  %p363_p4 = scmp.lt.s32.totalorder (!%p295_p3), %s882_s24, 1  ;;  %vm450_vm0 = vcmask (!%p295_p3), 130048   ;;  %v892_v16 = vmov (!%p295_p3), 0   ;;  %vm570_vm1 = vcmask (!%p295_p3), 7168   ;;  %v541_v40 = vlaneseq (!%p295_p3) }
   0x7   : > { %298 = sbr.rel (%p295_p3) target bundleno = 575 (0x23f), region = 40  ;;  %814 = vmatprep.subr.bf16.mxu0 (!%p295_p3), %v849_v0  ;;  %847 = vset.pattern.permute.xlu1 (!%p295_p3), %v892_v16  ;;  %v801_v17 = vld [vmem:[%s1014_s4] ss:$0 sm:$0xff] (!%p295_p3) }
   0x8   : > { %815 = vmatpush3.bf16.msra.mxu0 (!%p295_p3), %v849_v0  ;;  %848 = vset.pattern.permute.xlu0 (!%p295_p3), %v892_v16  ;;  %v542_v41 = vand.u32 (!%p295_p3), 127, %v541_v40 }
   0xe   : > { %s1023_s24 = smov (!%p363_p4, %s882_s24), 1 }
   0xf   : > { %s795_s30 = sshll.u32 %s1023_s24, 2  ;;  %s820_s8 = smul.u32 12, %s1023_s24 }
  0x10   : > { %s369_s11 = scalar_lea.vmem %s1010_s0, %s795_s30  ;;  %s962_s15 = smul.u32 24, %s1023_s24 }
  0x11   : > { %s377_s14 = scalar_lea.vmem %s1011_s1, %s820_s8  ;;  %v414_v1 = vld [vmem:[%s369_s11] sm:$0xf] }
  0x12   : > { %v411_v2 = vld [vmem:[%s377_s14] sm:$0xf]  ;;  %v412_v3 = vld [vmem:[%s377_s14 + $0x4] sm:$0xf]  ;;  %v413_v4 = vld [vmem:[%s377_s14 + $0x8] sm:$0xf]  ;;  %s401_s20 = scalar_lea.vmem %s1016_s6, %s962_s15  ;;  %s385_s23 = scalar_lea.vmem %s1012_s2, %s962_s15 }
  0x13   : > { %v415_v5 = vadd.bf16 %v414_v1, %v411_v2  ;;  %v416_v6 = vadd.bf16 %v414_v1, %v412_v3  ;;  %v417_v7 = vadd.bf16 %v414_v1, %v413_v4  ;;  %v543_v28 = vld [vmem:[%s385_s23] sm:$0xff]  ;;  %v545_v29 = vld [vmem:[%s385_s23 + $0x10] sm:$0xff]  ;;  %v544_v30 = vld [vmem:[%s385_s23 + $0x8] sm:$0xff]  ;;  %s393_s29 = scalar_lea.vmem %s1015_s5, %s962_s15  ;;  %s409_s9 = scalar_lea.vmem %s1017_s7, %s962_s15 }
  0x15   : > { %v418_v8 = vunpack.c.l.bf16 %v415_v5  ;;  %v419_v9 = vunpack.c.l.bf16 %v416_v6  ;;  %v420_v10 = vunpack.c.l.bf16 %v417_v7 }
  0x17   : > { %850 = vtanh.f32 %v418_v8 }
  0x18   : > { %852 = vtanh.f32 %v419_v9 }
  0x19   : > { %854 = vtanh.f32 %v420_v10 }
  0x21   : > { %v851_v11 = vpop.eup %850 }
  0x22   : > { %v853_v12 = vpop.eup %852 }
  0x23   : > { %v855_v13 = vpop.eup %854  ;;  %v809_v14 = vpack.c.bf16 %v853_v12, %v851_v11 }
  0x24   : > { %v810_v15 = vpack.c.bf16 %v855_v13, %v855_v13 }
  0x25   : > { %816 = vmatprep.mubr.msk.bf16.mxu0 %vm450_vm0, %v809_v14 }
  0x26   : > { %817 = vmatmul.mubr.msk.bf16.vlgmr.msra.gmra.mrb[0].mxu0 %vm450_vm0, %v810_v15 }
  0xf9   : > { %v818_v18 = vpop.f32.mrb[0].mxu0 }
  0xfa   : > { %v500_v19 = vadd.f32 %v818_v18, %v801_v17  ;;  %v491_v20 = vpop.f32.mrb[1].mxu0 }
  0xfb   : > { %v492_v21 = vadd.f32 %v801_v17, %v491_v20  ;;  %v819_v22 = vpop.f32.mrb[2].mxu0 }
  0xfc   : > { %576 = vst.msk [vmem:[%s401_s20 + $0x10] sm:$0xff] %vm570_vm1, %v500_v19  ;;  %v494_v23 = vpop.f32.mrb[3].mxu0  ;;  %v511_v24 = vsel %vm450_vm0, %v500_v19, -inf }
  0xfd   : > { %574 = vst.msk [vmem:[%s401_s20] sm:$0xff] %vm570_vm1, %v492_v21  ;;  %v495_v25 = vadd.f32 %v801_v17, %v494_v23  ;;  %512 = vmax.xlane.f32.xlu1 %v511_v24  ;;  %v505_v26 = vsel %vm450_vm0, %v492_v21, -inf }
  0xfe   : > { %506 = vmax.xlane.f32.xlu0 %v505_v26 }
  0xff   : > { %575 = vst.msk [vmem:[%s401_s20 + $0x8] sm:$0xff] %vm570_vm1, %v495_v25  ;;  %v508_v27 = vsel %vm450_vm0, %v495_v25, -inf }
 0x102   : > { %509 = vmax.xlane.f32.xlu0 %v508_v27 }
 0x10e   : > { %547 = vperm.xlu1 %847, %v543_v28  }
 0x112   : > { %553 = vperm.xlu1 %847, %v545_v29  }
 0x118   : > { %550 = vperm.xlu0 %848, %v544_v30  }
 0x18a   : > { %v513_v31 = vpop.xlane.xlu1 %512 }
 0x18b   : > { %v516_v32 = vsub.f32 %v500_v19, %v513_v31  ;;  %v507_v33 = vpop.xlane.xlu0 %506 }
 0x18c   : > { %v514_v34 = vsub.f32 %v492_v21, %v507_v33 }
 0x18d   : > { %v521_v35 = vmul.f32 1.442695, %v516_v32 }
 0x18e   : > { %v517_v36 = vmul.f32 1.442695, %v514_v34  ;;  %v548_v43 = vpop.permute.xlu1 %547 }
 0x18f   : > { %v510_v37 = vpop.xlane.xlu0 %509  ;;  %vm555_vm2 = vcmp.eq.s32.totalorder %v542_v41, %v548_v43 }
 0x190   : > { %856 = vpow2.f32 %v517_v36  ;;  %v515_v38 = vsub.f32 %v495_v25, %v510_v37  ;;  %v558_v50 = vsel %vm555_vm2, %v492_v21, 0.0 }
 0x191   : > { %858 = vpow2.f32 %v521_v35  ;;  %v561_v52 = vsel %vm450_vm0, %v558_v50, 0.0 }
 0x192   : > { %v519_v39 = vmul.f32 1.442695, %v515_v38  ;;  %v554_v51 = vpop.permute.xlu1 %553 }
 0x193   : > { %vm557_vm4 = vcmp.eq.s32.totalorder %v542_v41, %v554_v51 }
 0x194   : > { %860 = vpow2.f32 %v519_v39  ;;  %v560_v55 = vsel %vm557_vm4, %v500_v19, 0.0 }
 0x195   : > { %v567_v56 = vsel %vm450_vm0, %v560_v55, 0.0 }
 0x197   : > { %v551_v47 = vpop.permute.xlu0 %550 }
 0x198   : > { %vm556_vm3 = vcmp.eq.s32.totalorder %v542_v41, %v551_v47 }
 0x199   : > { %v559_v53 = vsel %vm556_vm3, %v495_v25, 0.0 }
 0x19a   : > { %v857_v42 = vpop.eup %856  ;;  %v564_v54 = vsel %vm450_vm0, %v559_v53, 0.0 }
 0x19b   : > { %v523_v44 = vsel %vm450_vm0, %v857_v42, 0.0  ;;  %v859_v45 = vpop.eup %858 }
 0x19c   : > { %524 = vadd.xlane.f32.xlu1 %v523_v44  ;;  %v529_v48 = vsel %vm450_vm0, %v859_v45, 0.0 }
 0x19e   : > { %v861_v46 = vpop.eup %860 }
 0x19f   : > { %v526_v49 = vsel %vm450_vm0, %v861_v46, 0.0 }
 0x1a0   : > { %530 = vadd.xlane.f32.xlu1 %v529_v48  ;;  %527 = vadd.xlane.f32.xlu0 %v526_v49 }
 0x1a4   : > { %562 = vadd.xlane.f32.xlu1 %v561_v52 }
 0x1a8   : > { %565 = vadd.xlane.f32.xlu1 %v564_v54 }
 0x1ac   : > { %568 = vadd.xlane.f32.xlu1 %v567_v56 }
 0x229   : > { %v525_v57 = vpop.xlane.xlu1 %524 }
 0x22a   : > { %862 = vlog2.f32 %v525_v57 }
 0x22d   : > { %v531_v58 = vpop.xlane.xlu1 %530  ;;  %v528_v59 = vpop.xlane.xlu0 %527 }
 0x22e   : > { %864 = vlog2.f32 %v531_v58 }
 0x22f   : > { %866 = vlog2.f32 %v528_v59 }
 0x231   : > { %v563_v60 = vpop.xlane.xlu1 %562 }
 0x232   : > { %571 = vst.msk [vmem:[%s393_s29] sm:$0xff] %vm570_vm1, %v563_v60 }
 0x234   : > { %v863_v61 = vpop.eup %862 }
 0x235   : > { %v533_v62 = vmul.f32 0.6931472, %v863_v61  ;;  %v566_v63 = vpop.xlane.xlu1 %565 }
 0x236   : > { %572 = vst.msk [vmem:[%s393_s29 + $0x8] sm:$0xff] %vm570_vm1, %v566_v63 }
 0x237   : > { %v538_v0 = vadd.f32 %v533_v62, %v507_v33 }
 0x238   : > { %v865_v1 = vpop.eup %864 }
 0x239   : > { %v867_v2 = vpop.eup %866  ;;  %577 = vst.msk [vmem:[%s409_s9] sm:$0xff] %vm570_vm1, %v538_v0  ;;  %v537_v3 = vmul.f32 0.6931472, %v865_v1  ;;  %v569_v4 = vpop.xlane.xlu1 %568 }
 0x23a   : > { %v535_v5 = vmul.f32 0.6931472, %v867_v2  ;;  %573 = vst.msk [vmem:[%s393_s29 + $0x10] sm:$0xff] %vm570_vm1, %v569_v4 }
 0x23b   : > { %v540_v6 = vadd.f32 %v537_v3, %v513_v31 }
 0x23c   : > { %v539_v7 = vadd.f32 %v535_v5, %v510_v37 }
 0x23d   : > { %579 = vst.msk [vmem:[%s409_s9 + $0x10] sm:$0xff] %vm570_vm1, %v540_v6 }
 0x23e   : > { %578 = vst.msk [vmem:[%s409_s9 + $0x8] sm:$0xff] %vm570_vm1, %v539_v7 }
 0x23f PF: > { %s18_s26 = sadd.s32 1, %s890_s26   ;;  %s1018_s24 = smov %s886_s25 }
 0x240   : > { %p15_p5 = scmp.ge.s32.totalorder %s18_s26, 4   ;;  %s1019_s25 = smov %s1021_s27 }
 0x242   :  { %17 = sbr.rel (!%p15_p5) target bundleno = 2 (0x2), region = 100 }

</bundles_post_ra>
